<compile_context>
chip_gen: v5e
topology: v5e:2x2
jax: 0.10.0
libtpu: 0.0.40
codegen_flags: <defaults>
</compile_context>

<pallas_src>
import math

import jax
import jax.numpy as jnp
from jax.experimental import pallas as pl
from jax.experimental.pallas import tpu as pltpu


# ----------------------------------------------------------------------------
# Kernel: one fused tile
#   out = (x -> bf16) @ Wx  (f32 MXU accumulation)  +  pe_rows (f32, bias folded)
# ----------------------------------------------------------------------------
def _dual_model_kernel(x_ref, pe_ref, w_ref, o_ref):
    x = x_ref[...].astype(w_ref.dtype)                       # VPU cast f32->bf16
    acc = jnp.dot(x, w_ref[...], preferred_element_type=jnp.float32)
    o_ref[...] = (acc + pe_ref[...]).astype(o_ref.dtype)


# ----------------------------------------------------------------------------
# Helpers
# ----------------------------------------------------------------------------
def _round_up(x, m):
    return ((x + m - 1) // m) * m


def _packing(hidden_dim):
    """Lane-dense output packing.

    Returns (pack, h_pad) with pack a power of two and pack * h_pad a multiple
    of 128, h_pad >= hidden_dim, so every output store is a full 128-lane vreg
    (no masked vst), even when hidden_dim does not divide 128.
    """
    if hidden_dim >= 128:
        return 1, _round_up(hidden_dim, 128)
    pack = 1
    while pack * 2 <= 128 // hidden_dim:
        pack *= 2
    return pack, 128 // pack


def _choose_row_tiling(n_rows, max_tile, num_cores):
    """Row-tile / grid over packed rows.

    Big tiles amortize the ~0.35us per-grid-step overhead; multiple of 16
    sublanes; single grid step when it fits (no pointless split on 1-TC
    chips); grid forced to a multiple of num_cores so v7x's two TensorCores
    get an even share of the 'parallel' axis.
    """
    n = _round_up(max(n_rows, 1), 16)
    grid = max(pl.cdiv(n, max_tile), num_cores)
    if num_cores > 1 and grid % num_cores:
        grid += num_cores - (grid % num_cores)
    tile = _round_up(pl.cdiv(n, grid), 16)
    return tile, grid


# ----------------------------------------------------------------------------
# One-time parameter folding (hoisted out of the forward hot path)
# ----------------------------------------------------------------------------
def fold_params(params, *, weight_dtype=jnp.bfloat16):
    hi = jax.lax.Precision.HIGHEST
    W_attr, b_attr = params["W_attr"], params["b_attr"]      # (H,A), (H,)
    W_E, b_E = params["W_E"], params["b_E"]                  # (H,2H), (H,)
    pe_tbl = params["pos_encoding"]                          # (L,H)
    H = b_attr.shape[0]
    A = W_attr.shape[1]
    pack, h_pad = _packing(H)

    w2a = W_E[:, :H].T                                       # (H,H)
    w2b = W_E[:, H:].T                                       # (H,H)
    w_fold = jnp.dot(W_attr.T, w2a, precision=hi)            # (A,H)
    b_fold = jnp.dot(b_attr[None, :], w2a, precision=hi)[0] + b_E        # (H,)
    pe_proj = jnp.dot(pe_tbl, w2b, precision=hi) + b_fold[None, :]       # (L,H)

    if h_pad != H:                                           # lane-dense padding
        w_fold = jnp.pad(w_fold, ((0, 0), (0, h_pad - H)))
        pe_proj = jnp.pad(pe_proj, ((0, 0), (0, h_pad - H)))

    # Block-diagonal replication so the packed layout stays a plain matmul.
    eye = jnp.eye(pack, dtype=w_fold.dtype)
    wx = jnp.kron(eye, w_fold).astype(weight_dtype)          # (pack*A, pack*h_pad)

    return {
        "wx": wx,
        "pe_proj": pe_proj.astype(jnp.float32),              # bias already folded in
        "attr_dim": A,
        "hidden_dim": H,
        "h_pad": h_pad,
        "pack": pack,
    }


# ----------------------------------------------------------------------------
# Forward
# ----------------------------------------------------------------------------
def user_dual_modelling_forward(user_attributes, positions, folded, *,
                                max_row_tile=2048, num_cores=1,
                                out_dtype=jnp.float32):
    """user_attributes: (B,S,A) f32; positions: (B,S) int32 -> (B,S,H) out_dtype."""
    B, S, A = user_attributes.shape
    H, h_pad, pack = folded["hidden_dim"], folded["h_pad"], folded["pack"]
    wx, pe_tbl = folded["wx"], folded["pe_proj"]
    N = B * S

    n_packed = pl.cdiv(N, pack)
    tm, grid = _choose_row_tiling(n_packed, max_row_tile, num_cores)
    total_packed = tm * grid
    n_pad = total_packed * pack

    # Positional rows: gather the projected+biased table (f32). Index 0 pads.
    # TODO(synk): move this data-dependent row gather in-kernel (scalar-prefetch
    # positions + VMEM-resident pe_proj table) to drop the (N, h_pad) HBM
    # round-trip; kept in XLA here because general in-kernel gather lowering is
    # not guaranteed for arbitrary table sizes.
    pos_flat = positions.reshape(N).astype(jnp.int32)
    if n_pad != N:
        pos_flat = jnp.pad(pos_flat, (0, n_pad - N))
    pe_p = pe_tbl[pos_flat].reshape(total_packed, pack * h_pad)   # row-major repack

    # Attributes stay f32 (cast happens in-kernel); only the ragged tail is padded.
    x = user_attributes.reshape(N, A)
    if n_pad != N:
        x = jnp.pad(x, ((0, n_pad - N), (0, 0)))
    x_p = x.reshape(total_packed, pack * A)

    out_itemsize = jnp.dtype(out_dtype).itemsize
    cost = pl.CostEstimate(
        flops=2 * total_packed * (pack * A) * (pack * h_pad),   # MACs actually run
        transcendentals=0,
        bytes_accessed=(total_packed * pack * A * 4             # x (f32)
                        + total_packed * pack * h_pad * 4       # pe rows (f32)
                        + int(wx.size) * wx.dtype.itemsize      # folded weights
                        + total_packed * pack * h_pad * out_itemsize),
    )

    out_p = pl.pallas_call(
        _dual_model_kernel,
        out_shape=jax.ShapeDtypeStruct((total_packed, pack * h_pad), out_dtype),
        grid_spec=pltpu.PrefetchScalarGridSpec(
            num_scalar_prefetch=0,
            grid=(grid,),
            in_specs=[
                pl.BlockSpec((tm, pack * A), lambda i: (i, 0)),           # x rows
                pl.BlockSpec((tm, pack * h_pad), lambda i: (i, 0)),       # pe rows
                pl.BlockSpec((pack * A, pack * h_pad), lambda i: (0, 0)),  # weights
            ],
            out_specs=pl.BlockSpec((tm, pack * h_pad), lambda i: (i, 0)),
        ),
        compiler_params=pltpu.CompilerParams(
            dimension_semantics=("parallel",),
        ),
        cost_estimate=cost,
    )(x_p, pe_p, wx)

    # Packed output is row-major identical to (n_pad, h_pad); drop padding.
    return out_p.reshape(n_pad, h_pad)[:N, :H].reshape(B, S, H)


# ----------------------------------------------------------------------------
# Deterministic parameter construction (mirrors the module's __init__)
# ----------------------------------------------------------------------------
def make_position_encoding(max_seq_len, dim):
    position = jnp.arange(max_seq_len, dtype=jnp.float32)[:, None]
    div_term = jnp.exp(jnp.arange(0, dim, 2, dtype=jnp.float32)
                       * (-math.log(10000.0) / dim))
    angles = position * div_term
    pe = jnp.zeros((max_seq_len, dim), dtype=jnp.float32)
    pe = pe.at[:, 0::2].set(jnp.sin(angles))
    pe = pe.at[:, 1::2].set(jnp.cos(angles))
    return pe


def init_params(key, attr_dim, hidden_dim, max_seq_len):
    k1, k2, k3, k4 = jax.random.split(key, 4)
    # PyTorch nn.Linear default init: U(-1/sqrt(fan_in), 1/sqrt(fan_in)).
    s1 = 1.0 / math.sqrt(attr_dim)
    s2 = 1.0 / math.sqrt(2 * hidden_dim)
    return {
        "W_attr": jax.random.uniform(k1, (hidden_dim, attr_dim),
                                     jnp.float32, -s1, s1),
        "b_attr": jax.random.uniform(k2, (hidden_dim,), jnp.float32, -s1, s1),
        "W_E": jax.random.uniform(k3, (hidden_dim, 2 * hidden_dim),
                                  jnp.float32, -s2, s2),
        "b_E": jax.random.uniform(k4, (hidden_dim,), jnp.float32, -s2, s2),
        "pos_encoding": make_position_encoding(max_seq_len, hidden_dim),
    }


# Pure-JAX f32 reference for verification (exact-precision einsums).
def reference_forward(user_attributes, positions, params):
    hi = jax.lax.Precision.HIGHEST
    attr = jnp.einsum("bsa,ha->bsh", user_attributes, params["W_attr"],
                      precision=hi) + params["b_attr"]
    pos = params["pos_encoding"][positions]
    comb = jnp.concatenate([attr, pos], axis=-1)
    return jnp.einsum("bsd,hd->bsh", comb, params["W_E"],
                      precision=hi) + params["b_E"]


if __name__ == "__main__":
    B, S, A, H, MAX_LEN = 2, 8, 4, 32, 16

    key = jax.random.PRNGKey(0)
    kp, kx, kpos = jax.random.split(key, 3)

    params = init_params(kp, A, H, MAX_LEN)
    user_attributes = jax.random.normal(kx, (B, S, A), dtype=jnp.float32)
    positions = jax.random.randint(kpos, (B, S), 0, MAX_LEN, dtype=jnp.int32)

    folded = fold_params(params)                       # one-time precompute
    out = user_dual_modelling_forward(user_attributes, positions, folded)
    out = jax.block_until_ready(out)

    ref = reference_forward(user_attributes, positions, params)
    assert out.shape == (B, S, H)
    # bf16 folded weights with f32 accumulation; pe branch + biases fully f32.
    assert jnp.allclose(out, ref, atol=3e-2, rtol=3e-2), "mismatch vs reference"

    print("KERNEL_OK")
</pallas_src>

<mosaic_0001>
module attributes {stable_mosaic.version = 11 : i64} {
  func.func @_dual_model_kernel(%arg0: i32, %arg1: memref<16x16xf32, #tpu.memory_space<vmem>>, %arg2: memref<16x128xf32, #tpu.memory_space<vmem>>, %arg3: memref<16x128xbf16, #tpu.memory_space<vmem>>, %arg4: memref<16x128xf32, #tpu.memory_space<vmem>>) attributes {dimension_semantics = [#tpu.dimension_semantics<parallel>], iteration_bounds = array<i64: 1>, scalar_prefetch = 0 : i64, scratch_operands = 0 : i64, tpu.core_type = #tpu.core_type<tc>, window_params = [{transform_indices = @transform_0, window_bounds = array<i64: 16, 16>}, {transform_indices = @transform_1, window_bounds = array<i64: 16, 128>}, {pipeline_mode = #tpu.pipeline_mode<synchronous>, transform_indices = @transform_2, window_bounds = array<i64: 16, 128>}, {transform_indices = @transform_3, window_bounds = array<i64: 16, 128>}]} {
    %c0 = arith.constant 0 : index
    %c0_0 = arith.constant 0 : index
    %0 = vector.load %arg1[%c0, %c0_0] : memref<16x16xf32, #tpu.memory_space<vmem>>, vector<16x16xf32>
    %1 = arith.truncf %0 : vector<16x16xf32> to vector<16x16xbf16>
    %c0_1 = arith.constant 0 : index
    %c0_2 = arith.constant 0 : index
    %2 = vector.load %arg3[%c0_1, %c0_2] : memref<16x128xbf16, #tpu.memory_space<vmem>>, vector<16x128xbf16>
    %cst = arith.constant dense<0.000000e+00> : vector<16x128xf32>
    %3 = tpu.matmul %1, %2, %cst {dimension_numbers = #tpu.dot_dimension_numbers<[1], [0], [0], [1], [0, 0, 1, 1], [], []>} : vector<16x16xbf16>, vector<16x128xbf16>, vector<16x128xf32> -> vector<16x128xf32>
    %c0_3 = arith.constant 0 : index
    %c0_4 = arith.constant 0 : index
    %4 = vector.load %arg2[%c0_3, %c0_4] : memref<16x128xf32, #tpu.memory_space<vmem>>, vector<16x128xf32>
    %5 = arith.addf %3, %4 : vector<16x128xf32>
    %c0_5 = arith.constant 0 : index
    %c0_6 = arith.constant 0 : index
    %6 = vector.load %arg4[%c0_5, %c0_6] : memref<16x128xf32, #tpu.memory_space<vmem>>, vector<16x128xf32>
    tpu.vector_store %arg4[%c0_5, %c0_6], %5 {strides = array<i32>} : memref<16x128xf32, #tpu.memory_space<vmem>>, vector<16x128xf32>,
    return
  }
  func.func @transform_0(%arg0: i32) -> (i32, i32) {
    %c0_i32 = arith.constant 0 : i32
    %c0_i32_0 = arith.constant 0 : i32
    return %arg0, %c0_i32 : i32, i32
  }
  func.func @transform_1(%arg0: i32) -> (i32, i32) {
    %c0_i32 = arith.constant 0 : i32
    %c0_i32_0 = arith.constant 0 : i32
    return %arg0, %c0_i32 : i32, i32
  }
  func.func @transform_2(%arg0: i32) -> (i32, i32) {
    %c0_i32 = arith.constant 0 : i32
    %c0_i32_0 = arith.constant 0 : i32
    %c0_i32_1 = arith.constant 0 : i32
    return %c0_i32, %c0_i32_0 : i32, i32
  }
  func.func @transform_3(%arg0: i32) -> (i32, i32) {
    %c0_i32 = arith.constant 0 : i32
    %c0_i32_0 = arith.constant 0 : i32
    return %arg0, %c0_i32 : i32, i32
  }
}

</mosaic_0001>

<bundles_post_ra>
// kernel: tpu_custom_call.1
= control target key start
LH: loop header
LB: loop body
LE: loop exit
PB: predicated region body
PF: predicated region fallthrough
CT: control target
= control target key end

     0   :  { %8 = vsyncpa [#allocation3], 0  ;;  %s281_s0 = inlined_call_operand.hbm [shape: f32[16,16], index: 0, kind: input, shape index: {}]   ;;  %s282_s1 = inlined_call_operand.hbm [shape: f32[16,128], index: 1, kind: input, shape index: {}]   ;;  %s283_s2 = inlined_call_operand.hbm [shape: bf16[16,128], index: 2, kind: input, shape index: {}]   ;;  %s284_s3 = inlined_call_operand.hbm [shape: f32[16,128], index: 3, kind: output, shape index: {}]  }
   0x1   :  { %9 = vsyncpa [#allocation6], 0 }
   0x2   :  { %10 = vsyncpa [#allocation4], 0  ;;  %s28_s14 = sshll.u32 %s282_s1, 4  ;;  %s232_s15 = smov [#allocation5]   ;;  %s29_s14 = int_to_ptr.hbm [resolvable:$true] %s28_s14 }
   0x3   :  { %s30_s16 = sshll.u32 %s232_s15, 4  ;;  %s15_s19 = sshll.u32 %s281_s0, 4  ;;  %s31_s16 = int_to_ptr.vmem [resolvable:$true] %s30_s16  ;;  %s16_s19 = int_to_ptr.hbm [resolvable:$true] %s15_s19 }
   0x4   :  { %s233_s20 = smov 128   ;;  %s234_s21 = smov 8  }
   0x5   :  { %36 = dma.hbm_to_vmem [thread:$0]  %s29_s14, 256, %s31_s16, [#allocation6], %s233_s20, %s233_s20, %s234_s21  }
   0x6   :  { %s235_s22 = smov [#allocation2]   ;;  %s41_s1 = sshll.u32 %s283_s2, 4  ;;  %s42_s1 = int_to_ptr.hbm [resolvable:$true] %s41_s1 }
   0x7   :  { %s17_s23 = sshll.u32 %s235_s22, 4  ;;  %s236_s0 = smov [#allocation7]   ;;  %s18_s23 = int_to_ptr.vmem [resolvable:$true] %s17_s23 }
   0x8   :  { %23 = dma.hbm_to_vmem [thread:$0]  %s16_s19, 256, %s18_s23, [#allocation3], %s233_s20, %s233_s20, %s234_s21  }
   0x9   :  { %s43_s26 = sshll.u32 %s236_s0, 4  ;;  %s237_s27 = smov 64   ;;  %s44_s26 = int_to_ptr.vmem [resolvable:$true] %s43_s26 }
   0xa   :  { %s238_s28 = smov 4  }
   0xb   :  { %49 = dma.hbm_to_vmem [thread:$0]  %s42_s1, 128, %s44_s26, [#allocation6], %s237_s27, %s237_s27, %s238_s28  }
   0xc   :  { %226 = dma.done.wait [#allocation3], 256  }
   0xd   :  { %227 = vsyncadd [#allocation3], 4294967040 }
   0xe   :  { %228 = dma.done.wait [#allocation6], 384  }
   0xf   :  { %229 = vsyncadd [#allocation6], 4294966912  ;;  %v121_v0 = vld [vmem:[#allocation7] sm:$0xff]  ;;  %v64_v2 = vld [vmem:[#allocation2 + $0x8] sm:$0xff]  ;;  %vm76_vm0 = vcmask 130048   ;;  %s239_s2 = smov [#allocation8]  }
  0x10   :  { %v63_v1 = vld [vmem:[#allocation2] sm:$0xff]  ;;  %87 = vmatpush.bf16.msra.mxu0 %v121_v0  ;;  %v68_v4 = vld [vmem:[#allocation5] sm:$0xff]  ;;  %v69_v7 = vld [vmem:[#allocation5 + $0x8] sm:$0xff]  ;;  %s100_s29 = sshll.u32 %s239_s2, 4  ;;  %s102_s5 = sshll.u32 %s284_s3, 4  ;;  %s101_s29 = int_to_ptr.vmem [resolvable:$true] %s100_s29  ;;  %s103_s5 = int_to_ptr.hbm [resolvable:$true] %s102_s5 }
  0x11   :  { %v65_v3 = vpack.c.bf16 %v64_v2, %v63_v1 }
  0x13   :  { %120 = vmatmul.msk.bf16.vlgmr.msra.gmra.mxu0 %vm76_vm0, %v65_v3 }
  0x90   :  { %v89_v5 = vpop.f32.mrf.mxu0 }
  0x91   :  { %v90_v6 = vadd.f32 %v89_v5, %v68_v4 }
  0x93   :  { %94 = vst [vmem:[#allocation8] sm:$0xff] %v90_v6 }
  0x98   :  { %v91_v8 = vpop.f32.mrf.mxu0 }
  0x99   :  { %v92_v9 = vadd.f32 %v91_v8, %v69_v7 }
  0x9b   :  { %95 = vst [vmem:[#allocation8 + $0x8] sm:$0xff] %v92_v9 }
  0x9c   :  { %108 = dma.vmem_to_hbm [thread:$0]  %s101_s29, 256, %s103_s5, [#allocation4], %s233_s20, %s233_s20, %s234_s21  }
  0x9d   :  { %230 = dma.done.wait [#allocation4], 256  }
  0x9e   :  { %231 = vsyncadd [#allocation4], 4294967040 }
  0x9f   :  { %113 = vsyncpa [#allocation3], 1 }
  0xa0   :  { %114 = vsyncpa [#allocation6], 1 }
  0xa1   :  { %115 = vsyncpa [#allocation4], 1 }

</bundles_post_ra>
